<compile_context>
chip_gen: v7x
topology: tpu7x:2x2x1
jax: 0.10.0
libtpu: 0.0.40
codegen_flags: <defaults>
</compile_context>

<pallas_src>
import jax
import jax.numpy as jnp
from jax.experimental import pallas as pl
from jax.experimental.pallas import tpu as pltpu


def _round_up(n, m):
    return ((n + m - 1) // m) * m


def agent_forward_kernel(s_ref, x_ref, lw_ref, lb_ref, o_ref):
    # s_ref : (3,)        f32 SMEM -- [conv_w0, conv_w1, conv_bias]
    # x_ref : (TM, W)     f32 VMEM -- row tile of the observation
    # lw_ref: (W, 32)     f32 VMEM -- linear weight (in, out), zero-padded last row
    # lb_ref: (1, 32)     f32 VMEM -- linear bias
    # o_ref : (TM, 32)    f32 VMEM -- forward() output row tile
    x = x_ref[...]
    W = x.shape[1]

    w0 = s_ref[0]
    w1 = s_ref[1]
    cb = s_ref[2]

    # x_next[:, w] == x[:, (w + 1) % W]  (XLU lane rotate, off the VPU/MXU path)
    x_next = pltpu.roll(x, shift=W - 1, axis=1)

    # 2-tap conv along the last axis + bias, then ReLU (all VPU, f32).
    h = jnp.maximum(w0 * x + w1 * x_next + cb, 0.0)

    # Column W-1 of h is the wrap-around column; it multiplies the all-zero
    # last row of lw_ref, so for finite observations it contributes exactly
    # nothing to the matmul -- no per-tile masking needed.
    y = jnp.dot(h, lw_ref[...], preferred_element_type=jnp.float32)
    o_ref[...] = y + lb_ref[...]

    # TODO(synk): fuse the actor/critic heads + masked softmax / log-prob /
    # entropy of get_action_and_value here (idle EUP/XLU slots) instead of
    # materializing the lane-sparse (R, 32) hidden -- forward() itself is
    # specified to return the hidden, so the fusion lives in a separate entry.


def prepare_agent_params(conv_w, conv_b, lin_w, lin_b):
    """One-time parameter prep (hoisted out of the per-step forward).

    conv_w : torch conv1.weight, shape (1, 1, 1, 2) (any shape with 2 elements)
    conv_b : torch conv1.bias,   shape (1,)
    lin_w  : torch linear.weight transposed to (in=W-1, out=32)
    lin_b  : torch linear.bias,  shape (32,)

    Returns (conv_scalars (3,), lw_pad (W, 32), lb (1, 32)), all f32.
    The linear weight gets one extra all-zero input row so the kernel's
    wrapped conv column contributes nothing to the matmul.
    """
    w01 = jnp.asarray(conv_w, jnp.float32).reshape(2)
    cb = jnp.asarray(conv_b, jnp.float32).reshape(1)
    scalars = jnp.concatenate([w01, cb])                        # (3,)

    lin_w = jnp.asarray(lin_w, jnp.float32)                     # (W-1, hidden)
    hidden = lin_w.shape[1]
    lw_pad = jnp.concatenate(
        [lin_w, jnp.zeros((1, hidden), jnp.float32)], axis=0)   # (W, hidden)
    lb = jnp.asarray(lin_b, jnp.float32).reshape(1, hidden)     # (1, hidden)
    return scalars, lw_pad, lb


def _pick_row_tile(R):
    """Row-tile heuristic.

    - No wrapper pad/slice: the grid is cdiv(R, tm), Pallas handles the edge.
    - Big tiles (up to 4096 rows) amortize the ~0.35us/grid-step overhead;
      even 4096x16 f32 double-buffered is ~0.5 MiB, trivially within VMEM on
      v5e/v6e (128 MiB) and v7x (64 MiB).
    - When there is enough work (>=512 rows) the batch is split into balanced
      tiles so the "parallel" row axis shards evenly onto v7x's two
      TensorCores; on v5e/v6e (1 TC) this is a measured no-op.
    """
    cap = 4096
    r8 = _round_up(R, 8)
    if r8 <= cap:
        if r8 >= 512:
            return _round_up(pl.cdiv(r8, 2), 8)     # two balanced tiles
        return r8                                    # single grid step
    nsteps = pl.cdiv(r8, cap)
    return _round_up(pl.cdiv(r8, nsteps), 8)         # balanced large tiles


def agent_forward(x, params):
    """Pallas equivalent of Agent.forward on pre-prepared params.

    x      : (R, W) f32   -- R rows (H, or stacked envs*timesteps), W == num_actions
    params : output of prepare_agent_params
    returns: (R, 32) f32
    """
    scalars, lw_pad, lb = params
    R, W = x.shape
    hidden = lw_pad.shape[1]
    assert lw_pad.shape[0] == W, "params must come from prepare_agent_params"

    tm = _pick_row_tile(R)
    grid = (pl.cdiv(R, tm),)

    cost = pl.CostEstimate(
        flops=2 * R * W * hidden + 5 * R * W,
        transcendentals=0,
        bytes_accessed=4 * (R * W + R * hidden + W * hidden + hidden + 3),
    )

    return pl.pallas_call(
        agent_forward_kernel,
        out_shape=jax.ShapeDtypeStruct((R, hidden), jnp.float32),
        grid=grid,
        in_specs=[
            pl.BlockSpec(memory_space=pltpu.MemorySpace.SMEM),     # (3,) conv scalars
            pl.BlockSpec((tm, W), lambda i: (i, 0)),               # x row tile
            pl.BlockSpec((W, hidden), lambda i: (0, 0)),           # linear weight (resident)
            pl.BlockSpec((1, hidden), lambda i: (0, 0)),           # linear bias (resident)
        ],
        out_specs=pl.BlockSpec((tm, hidden), lambda i: (i, 0)),
        compiler_params=pltpu.CompilerParams(dimension_semantics=("parallel",)),
        cost_estimate=cost,
    )(scalars, x.astype(jnp.float32), lw_pad, lb)

    # TODO(synk): if a consumer can accept a transposed (32, R) hidden, a
    # lane-dense layout (out minor dim = tm) would remove the masked partial
    # stores; forward()'s (R, 32) contract makes that a separate variant.


def agent_forward_ref(x, conv_w, conv_b, lin_w, lin_b):
    """Pure-JAX reference mirroring the PyTorch forward exactly."""
    w0, w1 = conv_w.reshape(2)
    conv = w0 * x[:, :-1] + w1 * x[:, 1:] + conv_b[0]   # (R, W-1)
    h = jnp.maximum(conv, 0.0)
    return h @ lin_w + lin_b                             # (R, 32)


if __name__ == "__main__":
    # Small shapes implied by the module: kernel_x=1, kernel_y=2 (defaults).
    H = 8                 # spatial rows of one observation
    num_actions = 16      # W == num_actions
    hidden = 32

    key = jax.random.PRNGKey(0)
    k_x, k_xb, k_cw, k_cb, k_lw, k_lb = jax.random.split(key, 6)

    # Deterministic synthetic parameters (module __init__ gives the shapes).
    conv_w = jax.random.normal(k_cw, (1, 1, 1, 2), jnp.float32) * 0.5   # conv1.weight
    conv_b = jax.random.normal(k_cb, (1,), jnp.float32) * 0.1           # conv1.bias
    lin_w = jax.random.normal(k_lw, (num_actions - 1, hidden), jnp.float32) * 0.1
    lin_b = jax.random.normal(k_lb, (hidden,), jnp.float32) * 0.1

    # One-time parameter prep (hoisted out of the forward path).
    params = jax.block_until_ready(prepare_agent_params(conv_w, conv_b, lin_w, lin_b))

    fwd = jax.jit(agent_forward)

    # Case 1: a single observation exactly as the module sees it: (H, W).
    # (Per-step RL with tiny R is launch-overhead bound -- batch timesteps
    # where possible; this case just validates correctness.)
    x = jax.random.normal(k_x, (H, num_actions), jnp.float32)
    out = jax.block_until_ready(fwd(x, params))
    ref = agent_forward_ref(x, conv_w.reshape(2), conv_b, lin_w, lin_b)
    assert out.shape == (H, hidden)
    assert jnp.allclose(out, ref, atol=1e-4, rtol=1e-4), "mismatch vs reference (single)"

    # Case 2: stacked envs/timesteps -> exercises the balanced row grid
    # (2 x 264-row tiles) and the partial-edge-block path (no pad/slice).
    R = 520
    xb = jax.random.normal(k_xb, (R, num_actions), jnp.float32)
    outb = jax.block_until_ready(fwd(xb, params))
    refb = agent_forward_ref(xb, conv_w.reshape(2), conv_b, lin_w, lin_b)
    assert outb.shape == (R, hidden)
    assert jnp.allclose(outb, refb, atol=1e-4, rtol=1e-4), "mismatch vs reference (batched)"

    # TODO(synk): get_action_and_value (Categorical sampling / log_prob /
    # entropy / host-side prints) and the actor/critic heads are outside
    # forward() and are not part of this kernel.
    print("KERNEL_OK")
</pallas_src>

<mosaic_0001>
module attributes {stable_mosaic.version = 11 : i64} {
  func.func @agent_forward_kernel(%arg0: i32, %arg1: memref<3xf32, #tpu.memory_space<smem>>, %arg2: memref<8x16xf32, #tpu.memory_space<vmem>>, %arg3: memref<16x32xf32, #tpu.memory_space<vmem>>, %arg4: memref<1x32xf32, #tpu.memory_space<vmem>>, %arg5: memref<8x32xf32, #tpu.memory_space<vmem>>) attributes {dimension_semantics = [#tpu.dimension_semantics<parallel>], iteration_bounds = array<i64: 1>, scalar_prefetch = 0 : i64, scratch_operands = 0 : i64, tpu.core_type = #tpu.core_type<tc>, window_params = [{transform_indices = @transform_0, window_bounds = array<i64: 3>}, {transform_indices = @transform_1, window_bounds = array<i64: 8, 16>}, {pipeline_mode = #tpu.pipeline_mode<synchronous>, transform_indices = @transform_2, window_bounds = array<i64: 16, 32>}, {pipeline_mode = #tpu.pipeline_mode<synchronous>, transform_indices = @transform_3, window_bounds = array<i64: 1, 32>}, {transform_indices = @transform_4, window_bounds = array<i64: 8, 32>}]} {
    %c0 = arith.constant 0 : index
    %c0_0 = arith.constant 0 : index
    %0 = vector.load %arg2[%c0, %c0_0] : memref<8x16xf32, #tpu.memory_space<vmem>>, vector<8x16xf32>
    %c0_1 = arith.constant 0 : index
    %1 = memref.load %arg1[%c0_1] : memref<3xf32, #tpu.memory_space<smem>>
    %c1 = arith.constant 1 : index
    %2 = memref.load %arg1[%c1] : memref<3xf32, #tpu.memory_space<smem>>
    %c2 = arith.constant 2 : index
    %3 = memref.load %arg1[%c2] : memref<3xf32, #tpu.memory_space<smem>>
    %c15_i32 = arith.constant 15 : i32
    %4 = tpu.dynamic_rotate %0 by %c15_i32 dim 1 : vector<8x16xf32>, i32 -> vector<8x16xf32>
    %5 = vector.broadcast %1 : f32 to vector<8x16xf32>
    %6 = arith.mulf %5, %0 : vector<8x16xf32>
    %7 = vector.broadcast %2 : f32 to vector<8x16xf32>
    %8 = arith.mulf %7, %4 : vector<8x16xf32>
    %9 = arith.addf %6, %8 : vector<8x16xf32>
    %10 = vector.broadcast %3 : f32 to vector<8x16xf32>
    %11 = arith.addf %9, %10 : vector<8x16xf32>
    %cst = arith.constant 0.000000e+00 : f32
    %12 = vector.broadcast %cst : f32 to vector<8x16xf32>
    %13 = arith.maximumf %11, %12 : vector<8x16xf32>
    %c0_2 = arith.constant 0 : index
    %c0_3 = arith.constant 0 : index
    %14 = vector.load %arg3[%c0_2, %c0_3] : memref<16x32xf32, #tpu.memory_space<vmem>>, vector<16x32xf32>
    %cst_4 = arith.constant dense<0.000000e+00> : vector<8x32xf32>
    %15 = tpu.matmul %13, %14, %cst_4 {dimension_numbers = #tpu.dot_dimension_numbers<[1], [0], [0], [1], [0, 0, 1, 1], [], []>} : vector<8x16xf32>, vector<16x32xf32>, vector<8x32xf32> -> vector<8x32xf32>
    %c0_5 = arith.constant 0 : index
    %c0_6 = arith.constant 0 : index
    %16 = vector.load %arg4[%c0_5, %c0_6] : memref<1x32xf32, #tpu.memory_space<vmem>>, vector<1x32xf32>
    %17 = vector.broadcast %16 : vector<1x32xf32> to vector<8x32xf32>
    %18 = arith.addf %15, %17 : vector<8x32xf32>
    %c0_7 = arith.constant 0 : index
    %c0_8 = arith.constant 0 : index
    %19 = vector.load %arg5[%c0_7, %c0_8] : memref<8x32xf32, #tpu.memory_space<vmem>>, vector<8x32xf32>
    tpu.vector_store %arg5[%c0_7, %c0_8], %18 {strides = array<i32>} : memref<8x32xf32, #tpu.memory_space<vmem>>, vector<8x32xf32>,
    return
  }
  func.func @transform_0(%arg0: i32) -> i32 {
    %c0_i32 = arith.constant 0 : i32
    %c0_i32_0 = arith.constant 0 : i32
    return %c0_i32 : i32
  }
  func.func @transform_1(%arg0: i32) -> (i32, i32) {
    %c0_i32 = arith.constant 0 : i32
    %c0_i32_0 = arith.constant 0 : i32
    return %arg0, %c0_i32 : i32, i32
  }
  func.func @transform_2(%arg0: i32) -> (i32, i32) {
    %c0_i32 = arith.constant 0 : i32
    %c0_i32_0 = arith.constant 0 : i32
    %c0_i32_1 = arith.constant 0 : i32
    return %c0_i32, %c0_i32_0 : i32, i32
  }
  func.func @transform_3(%arg0: i32) -> (i32, i32) {
    %c0_i32 = arith.constant 0 : i32
    %c0_i32_0 = arith.constant 0 : i32
    %c0_i32_1 = arith.constant 0 : i32
    return %c0_i32, %c0_i32_0 : i32, i32
  }
  func.func @transform_4(%arg0: i32) -> (i32, i32) {
    %c0_i32 = arith.constant 0 : i32
    %c0_i32_0 = arith.constant 0 : i32
    return %arg0, %c0_i32 : i32, i32
  }
}

</mosaic_0001>

<bundles_post_ra>
// kernel: agent_forward.1
= control target key start
LH: loop header
LB: loop body
LE: loop exit
PB: predicated region body
PF: predicated region fallthrough
CT: control target
= control target key end

     0   :  { %9 = vsyncpa [#allocation5], 0  ;;  %s376_s0 = inlined_call_operand.vmem [shape: f32[3], index: 0, kind: input, shape index: {}]   ;;  %s377_s1 = inlined_call_operand.hbm [shape: f32[8,16], index: 1, kind: input, shape index: {}]   ;;  %s378_s2 = inlined_call_operand.hbm [shape: f32[16,32], index: 2, kind: input, shape index: {}]   ;;  %s379_s3 = inlined_call_operand.vmem [shape: f32[1,32], index: 3, kind: input, shape index: {}]   ;;  %s380_s4 = inlined_call_operand.hbm [shape: f32[8,32], index: 4, kind: output, shape index: {}]  }
   0x1   :  { %10 = vsyncpa [#allocation3], 0 }
   0x2   :  { %11 = vsyncpa [#allocation8], 0 }
   0x3   :  { %12 = vsyncpa [#allocation4], 0  ;;  %s19_s17 = sshll.u32 %s376_s0, 4  ;;  %s20_s17 = int_to_ptr.vmem [resolvable:$true] %s19_s17 }
   0x4   :  { %s210_s18 = scalar_lea.vmem %s20_s17, 16  ;;  %p215_p1 = scmp.lt.s32.totalorder %s20_s17, %s20_s17 }
   0x5   :  { %p211_p0 = scmp.ne.s32.totalorder %s20_s17, %s210_s18  ;;  %p216_p2 = scmp.lt.s32.totalorder %s210_s18, %s210_s18 }
   0x7   :  { %p217_p3 = por %p216_p2, %p215_p1 }
   0x9   :  { %p218_p4 = pnand %p217_p3, %p211_p0 }
   0xb   :  { %221 = shalt.err (!%p218_p4)
}
   0xc   :  { %s296_s19 = smov [#allocation2]   ;;  %s297_s20 = smov [#allocation6]  }
   0xd   :  { %22 = dma.vmem_to_smem %s20_s17, 16, %s296_s19, [#allocation5]  }
   0xe   :  { %s29_s21 = sshll.u32 %s297_s20, 4  ;;  %s298_s22 = smov [#allocation7]   ;;  %s30_s21 = int_to_ptr.vmem [resolvable:$true] %s29_s21 }
   0xf   :  { %s38_s23 = sshll.u32 %s298_s22, 4  ;;  %s222_s26 = scalar_lea.hbm %s377_s1, 128  ;;  %s39_s23 = int_to_ptr.vmem [resolvable:$true] %s38_s23 }
  0x10   :  { %p223_p5 = scmp.ne.s32.totalorder %s377_s1, %s222_s26  ;;  %p226_p6 = scmp.lt.u32.totalorder %s222_s26, %s377_s1 }
  0x12   :  { %p228_p7 = pnand %p226_p6, %p223_p5 }
  0x14   :  { %231 = shalt.err (!%p228_p7)
}
  0x15   :  { %s232_s30 = scalar_lea.vmem %s30_s21, 128  ;;  %p237_p9 = scmp.lt.s32.totalorder %s30_s21, %s30_s21 }
  0x16   :  { %p233_p8 = scmp.ne.s32.totalorder %s30_s21, %s232_s30  ;;  %p238_p10 = scmp.lt.s32.totalorder %s232_s30, %s232_s30 }
  0x18   :  { %p239_p11 = por %p238_p10, %p237_p9 }
  0x1a   :  { %p240_p12 = pnand %p239_p11, %p233_p8 }
  0x1c   :  { %243 = shalt.err (!%p240_p12)
}
  0x1d   :  { %32 = dma.hbm_to_vmem [thread:$0]  %s377_s1, 128, %s30_s21, [#allocation3]  }
  0x1e   :  { %s244_s9 = scalar_lea.hbm %s378_s2, 256 }
  0x1f   :  { %p245_p13 = scmp.ne.s32.totalorder %s378_s2, %s244_s9  ;;  %p248_p0 = scmp.lt.u32.totalorder %s244_s9, %s378_s2 }
  0x21   :  { %p250_p1 = pnand %p248_p0, %p245_p13 }
  0x23   :  { %253 = shalt.err (!%p250_p1)
}
  0x24   :  { %s254_s14 = scalar_lea.vmem %s39_s23, 256  ;;  %p259_p3 = scmp.lt.s32.totalorder %s39_s23, %s39_s23 }
  0x25   :  { %p255_p2 = scmp.ne.s32.totalorder %s39_s23, %s254_s14  ;;  %p260_p4 = scmp.lt.s32.totalorder %s254_s14, %s254_s14 }
  0x27   :  { %p261_p5 = por %p260_p4, %p259_p3 }
  0x29   :  { %p262_p6 = pnand %p261_p5, %p255_p2 }
  0x2b   :  { %265 = shalt.err (!%p262_p6)
}
  0x2c   :  { %s299_s1 = smov 128   ;;  %s300_s15 = smov 8  }
  0x2d   :  { %44 = dma.hbm_to_vmem [thread:$0]  %s378_s2, 256, %s39_s23, [#allocation8], %s299_s1, %s299_s1, %s300_s15  }
  0x2e   :  { %288 = dma.done.wait [#allocation5], 16  }
  0x2f   :  { %289 = vsyncadd [#allocation5], 4294967280 }
  0x30   :  { %290 = dma.done.wait [#allocation3], 128  }
  0x31   :  { %291 = vsyncadd [#allocation3], 4294967168 }
  0x32   :  { %292 = dma.done.wait [#allocation8], 256  }
  0x33   :  { %293 = vsyncadd [#allocation8], 4294967040 }
  0x34   :  { %56 = sfence }
  0x35   :  { %v57_v0 = vld [vmem:[#allocation6] sm:$0xff]  ;;  %s301_s18 = smov 16   ;;  %vm61_vm0 = vcmask 1047680   ;;  %s182_s19 = sld [smem:[#allocation2 + $0x1]]  ;;  %v80_v3 = vld [vmem:[#allocation7] sm:$0xff]  ;;  %v81_v4 = vld [vmem:[#allocation7 + $0x8] sm:$0xff] }
  0x36   :  { %62 = vrot.lane.b32.xlu0 %v57_v0, %s301_s18  ;;  %v197_v5 = vpack.c.bf16 %v81_v4, %v80_v3  ;;  %v302_v6 = vmov 0.0|0.0   ;;  %vm303_vm1 = vmmov 0   ;;  %v304_v7 = vmov 0.0   ;;  %s305_s2 = smov 127   ;;  %s58_s20 = sld [smem:[#allocation2]] }
  0x37   :  { %196 = vmatprep.subr.bf16.mxu0 %v302_v6  ;;  %193 = vmatprep.mubr.msk.f32.mxu0 %vm303_vm1, %v304_v7  ;;  %s183_s21 = sld [smem:[#allocation2 + $0x2]]  ;;  %vm89_vm2 = vcmask 130048   ;;  %v184_v19 = vld [vmem:[%s379_s3] ss:$0 sm:$0xff]  ;;  %s306_s24 = smov [#allocation9]   ;;  %vm163_vm3 = vcmask 261120  }
  0x38   :  { %198 = vmatpush3.bf16.msra.mxu0 %v197_v5  ;;  %s171_s25 = sshll.u32 %s306_s24, 4  ;;  %s172_s25 = int_to_ptr.vmem [resolvable:$true] %s171_s25 }
  0x39   :  { %s266_s26 = scalar_lea.vmem %s172_s25, 128  ;;  %p271_p8 = scmp.lt.s32.totalorder %s172_s25, %s172_s25 }
  0x3a   :  { %p267_p7 = scmp.ne.s32.totalorder %s172_s25, %s266_s26  ;;  %p272_p9 = scmp.lt.s32.totalorder %s266_s26, %s266_s26 }
  0x3b   :  { %v70_v8 = vstv %s182_s19 }
  0x3c   :  { %v68_v12 = vstv %s58_s20  ;;  %p273_p10 = por %p272_p9, %p271_p8 }
  0x3d   :  { %v69_v13 = vmul.f32 %v68_v12, %v57_v0  ;;  %v77_v14 = vstv %s183_s21 }
  0x3e   :  { %p274_p11 = pnand %p273_p10, %p267_p7 }
  0xa8   :  { %v63_v1 = vpop.permute.xlu0 %62 }
  0xa9   :  { %v64_v2 = vsel %vm61_vm0, %v63_v1, %v57_v0 }
  0xaa   :  { %65 = vrot.lane.b32.xlu0 %v64_v2, %s301_s18 }
 0x11c   :  { %v66_v9 = vpop.permute.xlu0 %65 }
 0x11d   :  { %v67_v10 = vsel %vm61_vm0, %v66_v9, %v57_v0 }
 0x11e   :  { %v71_v11 = vmul.f32 %v70_v8, %v67_v10 }
 0x120   :  { %73 = vrot.lane.b32.xlu1 %v71_v11, %s305_s2 }
 0x192   :  { %v74_v15 = vpop.permute.xlu1 %73 }
 0x193   :  { %v76_v16 = vadd.f32 %v74_v15, %v69_v13 }
 0x195   :  { %v78_v17 = vadd.f32 %v77_v14, %v76_v16 }
 0x197   :  { %v79_v18 = vmax.f32 %v78_v17, 0.0 }
 0x199   :  { %194 = vmatmul.mubr.msk.f32.vlgmr.msra.gmra.mrb[0].mxu0 %vm89_vm2, %v79_v18 }
 0x26c   :  { %v159_v20 = vpop.f32.mrb[0].mxu0 }
 0x26d   :  { %v160_v21 = vadd.f32 %v184_v19, %v159_v20  ;;  %v195_v22 = vpop.f32.mrb[1].mxu0 }
 0x26f   :  { %164 = vst.msk [vmem:[#allocation9] sm:$0xff] %vm163_vm3, %v160_v21 }
 0x270   :  { %277 = shalt.err (!%p274_p11)
}
 0x271   :  { %s278_s28 = scalar_lea.hbm %s380_s4, 128 }
 0x272   :  { %p279_p12 = scmp.ne.s32.totalorder %s380_s4, %s278_s28  ;;  %p282_p13 = scmp.lt.u32.totalorder %s278_s28, %s380_s4 }
 0x274   :  { %p284_p0 = pnand %p282_p13, %p279_p12 }
 0x276   :  { %287 = shalt.err (!%p284_p0)
}
 0x277   :  { %174 = dma.vmem_to_hbm [thread:$0]  %s172_s25, 128, %s380_s4, [#allocation4]  }
 0x278   :  { %294 = dma.done.wait [#allocation4], 128  }
 0x279   :  { %295 = vsyncadd [#allocation4], 4294967168 }
 0x27a   :  { %178 = vsyncpa [#allocation3], 1 }
 0x27b   :  { %179 = vsyncpa [#allocation8], 1 }
 0x27c   :  { %180 = vsyncpa [#allocation4], 1 }
 0x27d   :  { %181 = vsyncpa [#allocation5], 1 }

</bundles_post_ra>
